<compile_context>
chip_gen: v5e
topology: v5e:2x2
jax: 0.10.0
libtpu: 0.0.40
codegen_flags: <defaults>
</compile_context>

<pallas_src>
import jax
import jax.numpy as jnp
from jax.experimental import pallas as pl
from jax.experimental.pallas import tpu as pltpu


def _argmax_kernel(logits_ref, out_ref):
    """Row-wise argmax over the class (lane) axis for one (TB, C) tile.

    logits_ref : (TB, C) float tile in VMEM (any float dtype)
    out_ref    : (TB, 1) int32 tile in VMEM
    """
    x = logits_ref[...]                                     # (TB, C), input dtype
    num_classes = x.shape[-1]

    lane_idx = jax.lax.broadcasted_iota(jnp.int32, x.shape, dimension=1)
    row_max = jnp.max(x, axis=-1, keepdims=True)            # (TB, 1)

    # np.argmax semantics: first index achieving the max; NaN counts as the
    # max (x == NaN is always False, so pick NaN lanes up explicitly).
    is_max = (x == row_max) | jnp.isnan(x)
    candidate = jnp.where(is_max, lane_idx, num_classes)    # sentinel for non-max
    out_ref[...] = jnp.min(candidate, axis=-1, keepdims=True).astype(jnp.int32)


def predict_on_batch(logits: jax.Array,
                     *,
                     max_rows_per_tile: int | None = None,
                     target_tile_bytes: int = 4 << 20) -> jax.Array:
    """Pallas equivalent of Model.predict_on_batch's np.argmax(preds, axis=1).

    logits: (B, C) float array (f32 or bf16)
    returns: (B,) int32 predicted class indices
    """
    B, C = logits.shape
    itemsize = jnp.dtype(logits.dtype).itemsize

    # Sublane granularity: 8 rows for 32-bit, 16 for bf16, 32 for 8-bit dtypes.
    row_mult = 8 * max(1, 4 // itemsize)

    # Rows per tile: aim for ~target_tile_bytes per input tile (2x that with
    # double buffering), rounded down to the sublane multiple.
    rows = max(row_mult,
               ((target_tile_bytes // max(1, C * itemsize)) // row_mult) * row_mult)
    if max_rows_per_tile is not None:
        rows = min(rows, max(row_mult, (max_rows_per_tile // row_mult) * row_mult))

    tb = min(rows, B)
    if tb != B and tb % row_mult != 0:
        tb = B  # safety: block rows must be a sublane multiple or the full batch

    grid = (pl.cdiv(B, tb),)

    out = pl.pallas_call(
        _argmax_kernel,
        out_shape=jax.ShapeDtypeStruct((B, 1), jnp.int32),
        grid=grid,
        in_specs=[pl.BlockSpec((tb, C), lambda i: (i, 0))],
        out_specs=pl.BlockSpec((tb, 1), lambda i: (i, 0)),
        compiler_params=pltpu.CompilerParams(
            dimension_semantics=("parallel",),   # batch rows independent -> megacore
            vmem_limit_bytes=32 * 1024 * 1024,   # well above 2 x ~4 MiB tiles, v7x-safe
        ),
    )(logits)
    return out[:, 0]


if __name__ == "__main__":
    key = jax.random.PRNGKey(0)
    B, C = 32, 16
    logits = jax.random.normal(key, (B, C), dtype=jnp.float32)

    # f32 logits, forced small tiles so the demo exercises the multi-block grid.
    preds = jax.block_until_ready(predict_on_batch(logits, max_rows_per_tile=8))
    ref = jnp.argmax(logits, axis=1).astype(jnp.int32)
    assert bool(jnp.all(preds == ref)), (preds, ref)

    # bf16 logits: half the HBM traffic, same kernel path.
    logits_bf16 = logits.astype(jnp.bfloat16)
    preds_bf16 = jax.block_until_ready(
        predict_on_batch(logits_bf16, max_rows_per_tile=8))
    ref_bf16 = jnp.argmax(logits_bf16, axis=1).astype(jnp.int32)
    assert bool(jnp.all(preds_bf16 == ref_bf16)), (preds_bf16, ref_bf16)

    # NaN handling matches np.argmax: a row containing NaN returns the index
    # of its first NaN.
    logits_nan = logits.at[3, 5].set(jnp.nan)
    preds_nan = jax.block_until_ready(
        predict_on_batch(logits_nan, max_rows_per_tile=8))
    assert int(preds_nan[3]) == 5, preds_nan

    print("KERNEL_OK")
</pallas_src>

<mosaic_0001>
module attributes {stable_mosaic.version = 11 : i64} {
  func.func @_argmax_kernel(%arg0: i32, %arg1: memref<8x16xf32, #tpu.memory_space<vmem>>, %arg2: memref<8x1xi32, #tpu.memory_space<vmem>>) attributes {dimension_semantics = [#tpu.dimension_semantics<parallel>], iteration_bounds = array<i64: 4>, scalar_prefetch = 0 : i64, scratch_operands = 0 : i64, tpu.core_type = #tpu.core_type<tc>, window_params = [{transform_indices = @transform_0, window_bounds = array<i64: 8, 16>}, {transform_indices = @transform_1, window_bounds = array<i64: 8, 1>}]} {
    %c0 = arith.constant 0 : index
    %c0_0 = arith.constant 0 : index
    %0 = vector.load %arg1[%c0, %c0_0] : memref<8x16xf32, #tpu.memory_space<vmem>>, vector<8x16xf32>
    %1 = tpu.iota {dimensions = array<i32: 1>} : vector<8x16xi32>
    %cst = arith.constant dense<0xFF800000> : vector<8xf32>
    %2 = vector.multi_reduction <maximumf>, %0, %cst [1] : vector<8x16xf32> to vector<8xf32>
    %3 = vector.shape_cast %2 : vector<8xf32> to vector<8x1xf32>
    %4 = vector.broadcast %3 : vector<8x1xf32> to vector<8x16xf32>
    %5 = arith.cmpf oeq, %0, %4 : vector<8x16xf32>
    %6 = arith.cmpf one, %0, %0 : vector<8x16xf32>
    %7 = arith.ori %5, %6 : vector<8x16xi1>
    %c16_i32 = arith.constant 16 : i32
    %8 = vector.broadcast %c16_i32 : i32 to vector<8x16xi32>
    %9 = arith.select %7, %1, %8 : vector<8x16xi1>, vector<8x16xi32>
    %cst_1 = arith.constant dense<2147483647> : vector<8xi32>
    %10 = vector.multi_reduction <minsi>, %9, %cst_1 [1] : vector<8x16xi32> to vector<8xi32>
    %11 = vector.shape_cast %10 : vector<8xi32> to vector<8x1xi32>
    %c0_2 = arith.constant 0 : index
    %c0_3 = arith.constant 0 : index
    %12 = vector.load %arg2[%c0_2, %c0_3] : memref<8x1xi32, #tpu.memory_space<vmem>>, vector<8x1xi32>
    tpu.vector_store %arg2[%c0_2, %c0_3], %11 {strides = array<i32>} : memref<8x1xi32, #tpu.memory_space<vmem>>, vector<8x1xi32>,
    return
  }
  func.func @transform_0(%arg0: i32) -> (i32, i32) {
    %c0_i32 = arith.constant 0 : i32
    %c0_i32_0 = arith.constant 0 : i32
    return %arg0, %c0_i32 : i32, i32
  }
  func.func @transform_1(%arg0: i32) -> (i32, i32) {
    %c0_i32 = arith.constant 0 : i32
    %c0_i32_0 = arith.constant 0 : i32
    return %arg0, %c0_i32 : i32, i32
  }
}

</mosaic_0001>

<bundles_post_ra>
// kernel: tpu_custom_call.1
= control target key start
LH: loop header
LB: loop body
LE: loop exit
PB: predicated region body
PF: predicated region fallthrough
CT: control target
= control target key end

     0   :  { %s228_s6 = smov 0   ;;  %s248_s0 = inlined_call_operand.vmem [shape: f32[32,16], index: 0, kind: input, shape index: {}]   ;;  %s249_s1 = inlined_call_operand.vmem [shape: s32[32,1], index: 1, kind: output, shape index: {}]  }
   0x1 LB: > { %s193_s7 = sadd.s32 4294967295, %s216_s6   ;;  %p197_p0 = scmp.ge.s32.totalorder %s216_s6, 1  ;;  %s216_s6 = sphi %s228_s6, %s11_s6  }
   0x2   : > { %p86_p1 = scmp.lt.s32.totalorder %s216_s6, 5 }
   0x4   : > { %p87_p2 = pnand %p197_p0, %p86_p1 }
   0x5   : > { %p104_p3 = scmp.lt.s32.totalorder (!%p87_p2), %s193_s7, 3 }
   0x6   : > { %90 = sbr.rel (%p87_p2) target bundleno = 379 (0x17b), region = 24 }
   0xb   : > { %s251_s7 = smov (!%p104_p3, %s193_s7), 3  ;;  %vm115_vm0 = vcmask 130048   ;;  %v113_v2 = vlaneseq  ;;  %vm138_vm5 = vcmask 7168  }
   0xc   : > { %s198_s8 = sshll.u32 %s251_s7, 3 }
   0xd   : > { %s107_s11 = scalar_lea.vmem %s248_s0, %s198_s8  ;;  %v114_v3 = vand.u32 127, %v113_v2  ;;  %s111_s14 = scalar_lea.vmem %s249_s1, %s198_s8 }
   0xe   : > { %v112_v0 = vld [vmem:[%s107_s11] sm:$0xff] }
   0xf   : > { %v116_v1 = vsel %vm115_vm0, %v112_v0, -inf  ;;  %vm120_vm1 = vcmp.ne.f32.partialorder %v112_v0, %v112_v0 }
  0x10   : > { %117 = vmax.xlane.f32.xlu0 %v116_v1 }
  0x83   : > { %v118_v4 = vpop.xlane.xlu0 %117 }
  0x84   : > { %vm119_vm2 = vcmp.eq.f32.partialorder %v112_v0, %v118_v4 }
  0x85   : > { %vm121_vm3 = vmor %vm119_vm2, %vm120_vm1 }
  0x86   : > { %v122_v5 = vsel %vm121_vm3, %v114_v3, 16 }
  0x87   : > { %v123_v6 = vsel %vm115_vm0, %v122_v5, 2147483647 }
  0x88   : > { %v125_v7 = vshra.s32 %v123_v6, 16  ;;  %v124_v9 = vand.u32 65535, %v123_v6 }
  0x8a   : > { %v127_v8 = vcvt.s32.f32 %v125_v7  ;;  %v126_v11 = vcvt.s32.f32 %v124_v9 }
  0x8c   : > { %128 = vmin.xlane.f32.xlu0 %v127_v8 }
  0xff   : > { %v129_v10 = vpop.xlane.xlu0 %128 }
 0x100   : > { %vm130_vm4 = vcmp.eq.f32.partialorder %v127_v8, %v129_v10  ;;  %v135_v13 = vcvt.f32.s32 %v129_v10 }
 0x101   : > { %v131_v12 = vsel %vm130_vm4, %v126_v11, inf }
 0x102   : > { %132 = vmin.xlane.f32.xlu1 %v131_v12  ;;  %v136_v15 = vshll.u32 %v135_v13, 16 }
 0x175   : > { %v133_v14 = vpop.xlane.xlu1 %132 }
 0x176   : > { %v134_v16 = vcvt.f32.s32 %v133_v14 }
 0x178   : > { %v137_v17 = vadd.s32 %v136_v15, %v134_v16 }
 0x17a   : > { %139 = vst.msk [vmem:[%s111_s14] sm:$0xff] %vm138_vm5, %v137_v17 }
 0x17b PF: > { %s11_s6 = sadd.s32 1, %s216_s6  }
 0x17c   : > { %p8_p4 = scmp.ge.s32.totalorder %s11_s6, 6  }
 0x17e   :  { %10 = sbr.rel (!%p8_p4) target bundleno = 1 (0x1), region = 54 }

</bundles_post_ra>
